<compile_context>
chip_gen: v7x
topology: tpu7x:2x2x1
jax: 0.10.0
libtpu: 0.0.40
codegen_flags: <defaults>
</compile_context>

<pallas_src>
import functools

import jax
import jax.numpy as jnp
from jax.experimental import pallas as pl
from jax.experimental.pallas import tpu as pltpu


def _stack_kernel(*refs, relu_flags, compute_dtype, batch_block):
    """Fully fused classify stack for one (batch-block, spatial-tile) block.

    refs layout: (x_ref, w0_ref, s0_ref, w1_ref, s1_ref, ..., o_ref)
      x_ref : (Bb, C_in, TL)   activations, NCW (channels=sublanes, L=lanes)
      wi_ref: (Cout_i, Cin_i)  conv weight with eval-mode BN scale folded (bf16)
      si_ref: (Cout_i, 1)      per-channel shift (folded BN shift + bias), f32
      o_ref : (Bb, Cout_last, TL)
    """
    x_ref = refs[0]
    o_ref = refs[-1]
    layer_refs = refs[1:-1]
    n_layers = len(relu_flags)

    # Load the (tiny) weights / shifts once; reused by every batch slice.
    ws = [layer_refs[2 * li][...] for li in range(n_layers)]
    ss = [layer_refs[2 * li + 1][...] for li in range(n_layers)]

    # Static Python loop over batch slices (unrolled at trace time): amortizes
    # the fixed per-grid-step cost over `batch_block` batch elements.
    for bb in range(batch_block):
        # Activation stays in (C, TL) layout for the whole stack; each 1x1
        # Conv1d is one MXU matmul, no transposes. The astype is a no-op when
        # the caller already provides bf16 activations.
        h = x_ref[bb].astype(compute_dtype)
        for li in range(n_layers):
            acc = jnp.dot(ws[li], h, preferred_element_type=jnp.float32)
            y = acc + ss[li]              # epilogue in f32 (v5e has no bf16 VPU)
            if relu_flags[li]:
                y = jnp.maximum(y, 0.0)
            # Narrow to the MXU dtype only when feeding another matmul.
            h = y.astype(compute_dtype) if li + 1 < n_layers else y
            # Dropout(0.1): identity in eval mode.
        o_ref[bb] = h.astype(o_ref.dtype)


def init_classify_params(mlp, key):
    """Deterministic parameter init mirroring the PyTorch classify.__init__.

    NOTE: mirrors the reference constructor EXACTLY, including its
    `out_channel == mlp[-1]` break — e.g. mlp=[32, 5, 5] stops at the first
    5-channel conv, just like the PyTorch module does.
    """
    params = []
    last_channel = mlp[0]
    for out_channel in mlp[1:]:
        key, kw, kb, kg, kbe, km, kv = jax.random.split(key, 7)
        # Conv1d(last_channel, out_channel, kernel_size=1): weight (Cout, Cin, 1)
        w = jax.random.normal(kw, (out_channel, last_channel), jnp.float32) * 0.1
        b = jax.random.normal(kb, (out_channel,), jnp.float32) * 0.1
        is_last = out_channel == mlp[-1]
        layer = {"w": w, "b": b, "has_bn": not is_last}
        if not is_last:
            # BatchNorm1d(out_channel): gamma, beta, running_mean, running_var
            layer["gamma"] = 1.0 + 0.1 * jax.random.normal(kg, (out_channel,), jnp.float32)
            layer["beta"] = 0.1 * jax.random.normal(kbe, (out_channel,), jnp.float32)
            layer["running_mean"] = 0.1 * jax.random.normal(km, (out_channel,), jnp.float32)
            layer["running_var"] = 1.0 + 0.1 * jnp.abs(
                jax.random.normal(kv, (out_channel,), jnp.float32))
        params.append(layer)
        if is_last:
            break
        last_channel = out_channel
    return params


def prepare_fused_params(params, *, eps=1e-5, compute_dtype=jnp.bfloat16):
    """Fold eval-mode BN + conv bias into (scaled weight, shift) per layer."""
    fused = []
    for layer in params:
        w = layer["w"]            # (Cout, Cin)
        b = layer["b"]            # (Cout,)
        cout = w.shape[0]
        if layer["has_bn"]:
            inv_std = 1.0 / jnp.sqrt(layer["running_var"] + eps)
            scale = layer["gamma"] * inv_std                               # (Cout,)
            shift = layer["beta"] - layer["running_mean"] * scale + b * scale
            w_fused = w * scale[:, None]   # fold per-channel scale into weight rows
            relu = True
        else:
            w_fused = w
            shift = b
            relu = False
        fused.append((w_fused.astype(compute_dtype),
                      shift.reshape(cout, 1).astype(jnp.float32),
                      relu))
    return fused


def classify_forward(fused_params, x, *, batch_block=8, tl_max=2048,
                     compute_dtype=jnp.bfloat16):
    """x: (B, C_in, L) in NCW layout (as PyTorch Conv1d), f32 or bf16.

    Returns (B, C_out, L) in x.dtype. Eval-mode semantics.
    """
    B, C_in, L = x.shape
    c_out_last = fused_params[-1][0].shape[0]

    # Spatial tile: full L for small problems, otherwise a lane-aligned
    # (multiple-of-128) tile; a partial last tile is handled by masked stores.
    assert tl_max % 128 == 0
    TL = L if L <= tl_max else tl_max

    # Batch blocking: Bb batch elements per grid step.
    Bb = max(1, min(B, batch_block))
    grid_b = pl.cdiv(B, Bb)
    grid_l = pl.cdiv(L, TL)
    # v7x has 2 TensorCores: if the whole problem collapsed to one grid step,
    # split the batch so both cores get work.
    if grid_b * grid_l < 2 and B >= 2:
        Bb = pl.cdiv(B, 2)
        grid_b = pl.cdiv(B, Bb)
    grid = (grid_b, grid_l)

    kernel = functools.partial(
        _stack_kernel,
        relu_flags=tuple(p[2] for p in fused_params),
        compute_dtype=compute_dtype,
        batch_block=Bb)

    flat_inputs = [x]
    for w, s, _ in fused_params:
        flat_inputs += [w, s]

    def build(single_buffer_weights):
        # Weights/shifts have a constant index_map -> DMA'd once, resident
        # across the whole grid; single-buffering them avoids pointless
        # double-buffer allocation / per-step revisit bookkeeping.
        w_kwargs = ({"pipeline_mode": pl.Buffered(1)}
                    if single_buffer_weights else {})
        in_specs = [pl.BlockSpec((Bb, C_in, TL), lambda b, l: (b, 0, l))]
        for w, _, _ in fused_params:
            co, ci = w.shape
            in_specs.append(pl.BlockSpec((co, ci), lambda b, l: (0, 0), **w_kwargs))
            in_specs.append(pl.BlockSpec((co, 1), lambda b, l: (0, 0), **w_kwargs))
        return pl.pallas_call(
            kernel,
            out_shape=jax.ShapeDtypeStruct((B, c_out_last, L), x.dtype),
            grid=grid,
            in_specs=in_specs,
            out_specs=pl.BlockSpec((Bb, c_out_last, TL), lambda b, l: (b, 0, l)),
            compiler_params=pltpu.CompilerParams(
                dimension_semantics=("parallel", "parallel"),
                # Explicit scoped-VMEM budget: well above actual use at
                # Bb=8 / TL=2048, below every chip's physical VMEM
                # (v7x: 64 MiB), and above v5e's 16 MiB scoped default.
                vmem_limit_bytes=32 * 1024 * 1024),
        )

    try:
        return build(True)(*flat_inputs)
    except Exception:
        # pl.Buffered(1) on the constant-index weight blocks is a small,
        # optional optimization; if this jax version rejects it, fall back to
        # the default (double-buffered) pipelining.
        return build(False)(*flat_inputs)


def classify_reference(params, x, *, eps=1e-5):
    """Pure-JAX (f32, unfused) eval-mode reference of the PyTorch module."""
    h = x
    for layer in params:
        w, b = layer["w"], layer["b"]
        h = jnp.einsum("oc,bcl->bol", w, h) + b[None, :, None]
        if layer["has_bn"]:
            inv_std = 1.0 / jnp.sqrt(layer["running_var"] + eps)
            h = (h - layer["running_mean"][None, :, None]) * inv_std[None, :, None]
            h = h * layer["gamma"][None, :, None] + layer["beta"][None, :, None]
            h = jnp.maximum(h, 0.0)
            # Dropout(0.1): identity in eval mode.
    return h


if __name__ == "__main__":
    key = jax.random.PRNGKey(0)
    k_param, k_x, k_x2 = jax.random.split(key, 3)

    mlp = [32, 64, 64, 5]          # mlp[0] = input channels, mlp[-1] = num classes
    params = init_classify_params(mlp, k_param)
    fused = prepare_fused_params(params)

    # --- small shape (module's nominal use), f32 input ----------------------
    B, L = 2, 16
    x = jax.random.normal(k_x, (B, mlp[0], L), jnp.float32)   # NCW, like PyTorch
    out = jax.block_until_ready(classify_forward(fused, x))
    assert out.shape == (B, mlp[-1], L), out.shape
    assert jnp.all(jnp.isfinite(out))
    ref = classify_reference(params, x)
    assert float(jnp.max(jnp.abs(out - ref))) < 1e-1

    # bf16 activation path: no wrapper-side cast, the kernel ingests bf16
    # directly (halves the dominant HBM read stream when the producer emits bf16).
    out_bf16 = jax.block_until_ready(classify_forward(fused, x.astype(jnp.bfloat16)))
    assert out_bf16.shape == (B, mlp[-1], L)
    assert jnp.all(jnp.isfinite(out_bf16.astype(jnp.float32)))

    # --- larger shape exercising batch blocking + spatial tiling with
    #     non-divisible B and L (masked partial blocks on both axes) ---------
    B2, L2 = 10, 2500
    x2 = jax.random.normal(k_x2, (B2, mlp[0], L2), jnp.float32)
    out2 = jax.block_until_ready(classify_forward(fused, x2))
    assert out2.shape == (B2, mlp[-1], L2), out2.shape
    assert jnp.all(jnp.isfinite(out2))
    ref2 = classify_reference(params, x2)
    assert float(jnp.max(jnp.abs(out2 - ref2))) < 2e-1

    print("KERNEL_OK")
</pallas_src>

<mosaic_0001>
module attributes {stable_mosaic.version = 11 : i64} {
  func.func @_stack_kernel(%arg0: i32, %arg1: i32, %arg2: memref<1x32x16xf32, #tpu.memory_space<vmem>>, %arg3: memref<64x32xbf16, #tpu.memory_space<vmem>>, %arg4: memref<64x1xf32, #tpu.memory_space<vmem>>, %arg5: memref<64x64xbf16, #tpu.memory_space<vmem>>, %arg6: memref<64x1xf32, #tpu.memory_space<vmem>>, %arg7: memref<5x64xbf16, #tpu.memory_space<vmem>>, %arg8: memref<5x1xf32, #tpu.memory_space<vmem>>, %arg9: memref<1x5x16xf32, #tpu.memory_space<vmem>>) attributes {dimension_semantics = [#tpu.dimension_semantics<parallel>, #tpu.dimension_semantics<parallel>], iteration_bounds = array<i64: 2, 1>, scalar_prefetch = 0 : i64, scratch_operands = 0 : i64, tpu.core_type = #tpu.core_type<tc>, window_params = [{transform_indices = @transform_0, window_bounds = array<i64: 1, 32, 16>}, {pipeline_mode = #tpu.pipeline_mode<synchronous>, transform_indices = @transform_1, window_bounds = array<i64: 64, 32>}, {pipeline_mode = #tpu.pipeline_mode<synchronous>, transform_indices = @transform_2, window_bounds = array<i64: 64, 1>}, {pipeline_mode = #tpu.pipeline_mode<synchronous>, transform_indices = @transform_3, window_bounds = array<i64: 64, 64>}, {pipeline_mode = #tpu.pipeline_mode<synchronous>, transform_indices = @transform_4, window_bounds = array<i64: 64, 1>}, {pipeline_mode = #tpu.pipeline_mode<synchronous>, transform_indices = @transform_5, window_bounds = array<i64: 5, 64>}, {pipeline_mode = #tpu.pipeline_mode<synchronous>, transform_indices = @transform_6, window_bounds = array<i64: 5, 1>}, {transform_indices = @transform_7, window_bounds = array<i64: 1, 5, 16>}]} {
    %c0 = arith.constant 0 : index
    %c0_0 = arith.constant 0 : index
    %0 = vector.load %arg3[%c0, %c0_0] : memref<64x32xbf16, #tpu.memory_space<vmem>>, vector<64x32xbf16>
    %c0_1 = arith.constant 0 : index
    %c0_2 = arith.constant 0 : index
    %1 = vector.load %arg5[%c0_1, %c0_2] : memref<64x64xbf16, #tpu.memory_space<vmem>>, vector<64x64xbf16>
    %c0_3 = arith.constant 0 : index
    %c0_4 = arith.constant 0 : index
    %2 = vector.load %arg7[%c0_3, %c0_4] : memref<5x64xbf16, #tpu.memory_space<vmem>>, vector<5x64xbf16>
    %c0_5 = arith.constant 0 : index
    %c0_6 = arith.constant 0 : index
    %3 = vector.load %arg4[%c0_5, %c0_6] : memref<64x1xf32, #tpu.memory_space<vmem>>, vector<64x1xf32>
    %c0_7 = arith.constant 0 : index
    %c0_8 = arith.constant 0 : index
    %4 = vector.load %arg6[%c0_7, %c0_8] : memref<64x1xf32, #tpu.memory_space<vmem>>, vector<64x1xf32>
    %c0_9 = arith.constant 0 : index
    %c0_10 = arith.constant 0 : index
    %5 = vector.load %arg8[%c0_9, %c0_10] : memref<5x1xf32, #tpu.memory_space<vmem>>, vector<5x1xf32>
    %c0_11 = arith.constant 0 : index
    %c0_12 = arith.constant 0 : index
    %c0_13 = arith.constant 0 : index
    %6 = vector.load %arg2[%c0_11, %c0_12, %c0_13] : memref<1x32x16xf32, #tpu.memory_space<vmem>>, vector<1x32x16xf32>
    %7 = vector.shape_cast %6 : vector<1x32x16xf32> to vector<32x16xf32>
    %8 = arith.truncf %7 : vector<32x16xf32> to vector<32x16xbf16>
    %cst = arith.constant dense<0.000000e+00> : vector<64x16xf32>
    %9 = tpu.matmul %0, %8, %cst {dimension_numbers = #tpu.dot_dimension_numbers<[1], [0], [0], [1], [0, 0, 1, 1], [], []>} : vector<64x32xbf16>, vector<32x16xbf16>, vector<64x16xf32> -> vector<64x16xf32>
    %10 = vector.broadcast %3 : vector<64x1xf32> to vector<64x16xf32>
    %11 = arith.addf %9, %10 : vector<64x16xf32>
    %cst_14 = arith.constant 0.000000e+00 : f32
    %12 = vector.broadcast %cst_14 : f32 to vector<64x16xf32>
    %13 = arith.maximumf %11, %12 : vector<64x16xf32>
    %14 = arith.truncf %13 : vector<64x16xf32> to vector<64x16xbf16>
    %cst_15 = arith.constant dense<0.000000e+00> : vector<64x16xf32>
    %15 = tpu.matmul %1, %14, %cst_15 {dimension_numbers = #tpu.dot_dimension_numbers<[1], [0], [0], [1], [0, 0, 1, 1], [], []>} : vector<64x64xbf16>, vector<64x16xbf16>, vector<64x16xf32> -> vector<64x16xf32>
    %16 = vector.broadcast %4 : vector<64x1xf32> to vector<64x16xf32>
    %17 = arith.addf %15, %16 : vector<64x16xf32>
    %cst_16 = arith.constant 0.000000e+00 : f32
    %18 = vector.broadcast %cst_16 : f32 to vector<64x16xf32>
    %19 = arith.maximumf %17, %18 : vector<64x16xf32>
    %20 = arith.truncf %19 : vector<64x16xf32> to vector<64x16xbf16>
    %cst_17 = arith.constant dense<0.000000e+00> : vector<5x16xf32>
    %21 = tpu.matmul %2, %20, %cst_17 {dimension_numbers = #tpu.dot_dimension_numbers<[1], [0], [0], [1], [0, 0, 1, 1], [], []>} : vector<5x64xbf16>, vector<64x16xbf16>, vector<5x16xf32> -> vector<5x16xf32>
    %22 = vector.broadcast %5 : vector<5x1xf32> to vector<5x16xf32>
    %23 = arith.addf %21, %22 : vector<5x16xf32>
    %c0_18 = arith.constant 0 : index
    %c0_19 = arith.constant 0 : index
    %c0_20 = arith.constant 0 : index
    %24 = vector.load %arg9[%c0_18, %c0_19, %c0_20] : memref<1x5x16xf32, #tpu.memory_space<vmem>>, vector<1x5x16xf32>
    %25 = vector.shape_cast %24 : vector<1x5x16xf32> to vector<5x16xf32>
    %26 = vector.shape_cast %23 : vector<5x16xf32> to vector<1x5x16xf32>
    tpu.vector_store %arg9[%c0_18, %c0_19, %c0_20], %26 {strides = array<i32>} : memref<1x5x16xf32, #tpu.memory_space<vmem>>, vector<1x5x16xf32>,
    return
  }
  func.func @transform_0(%arg0: i32, %arg1: i32) -> (i32, i32, i32) {
    %c0_i32 = arith.constant 0 : i32
    %c0_i32_0 = arith.constant 0 : i32
    return %arg0, %c0_i32, %arg1 : i32, i32, i32
  }
  func.func @transform_1(%arg0: i32, %arg1: i32) -> (i32, i32) {
    %c0_i32 = arith.constant 0 : i32
    %c0_i32_0 = arith.constant 0 : i32
    %c0_i32_1 = arith.constant 0 : i32
    return %c0_i32, %c0_i32_0 : i32, i32
  }
  func.func @transform_2(%arg0: i32, %arg1: i32) -> (i32, i32) {
    %c0_i32 = arith.constant 0 : i32
    %c0_i32_0 = arith.constant 0 : i32
    %c0_i32_1 = arith.constant 0 : i32
    return %c0_i32, %c0_i32_0 : i32, i32
  }
  func.func @transform_3(%arg0: i32, %arg1: i32) -> (i32, i32) {
    %c0_i32 = arith.constant 0 : i32
    %c0_i32_0 = arith.constant 0 : i32
    %c0_i32_1 = arith.constant 0 : i32
    return %c0_i32, %c0_i32_0 : i32, i32
  }
  func.func @transform_4(%arg0: i32, %arg1: i32) -> (i32, i32) {
    %c0_i32 = arith.constant 0 : i32
    %c0_i32_0 = arith.constant 0 : i32
    %c0_i32_1 = arith.constant 0 : i32
    return %c0_i32, %c0_i32_0 : i32, i32
  }
  func.func @transform_5(%arg0: i32, %arg1: i32) -> (i32, i32) {
    %c0_i32 = arith.constant 0 : i32
    %c0_i32_0 = arith.constant 0 : i32
    %c0_i32_1 = arith.constant 0 : i32
    return %c0_i32, %c0_i32_0 : i32, i32
  }
  func.func @transform_6(%arg0: i32, %arg1: i32) -> (i32, i32) {
    %c0_i32 = arith.constant 0 : i32
    %c0_i32_0 = arith.constant 0 : i32
    %c0_i32_1 = arith.constant 0 : i32
    return %c0_i32, %c0_i32_0 : i32, i32
  }
  func.func @transform_7(%arg0: i32, %arg1: i32) -> (i32, i32, i32) {
    %c0_i32 = arith.constant 0 : i32
    %c0_i32_0 = arith.constant 0 : i32
    return %arg0, %c0_i32, %arg1 : i32, i32, i32
  }
}

module attributes {stable_mosaic.version = 11 : i64} {
  func.func @_stack_kernel(%arg0: i32, %arg1: i32, %arg2: memref<1x32x16xf32, #tpu.memory_space<vmem>>, %arg3: memref<64x32xbf16, #tpu.memory_space<vmem>>, %arg4: memref<64x1xf32, #tpu.memory_space<vmem>>, %arg5: memref<64x64xbf16, #tpu.memory_space<vmem>>, %arg6: memref<64x1xf32, #tpu.memory_space<vmem>>, %arg7: memref<5x64xbf16, #tpu.memory_space<vmem>>, %arg8: memref<5x1xf32, #tpu.memory_space<vmem>>, %arg9: memref<1x5x16xf32, #tpu.memory_space<vmem>>) attributes {dimension_semantics = [#tpu.dimension_semantics<parallel>, #tpu.dimension_semantics<parallel>], iteration_bounds = array<i64: 2, 1>, scalar_prefetch = 0 : i64, scratch_operands = 0 : i64, tpu.core_type = #tpu.core_type<tc>, window_params = [{transform_indices = @transform_0, window_bounds = array<i64: 1, 32, 16>}, {pipeline_mode = #tpu.pipeline_mode<synchronous>, transform_indices = @transform_1, window_bounds = array<i64: 64, 32>}, {pipeline_mode = #tpu.pipeline_mode<synchronous>, transform_indices = @transform_2, window_bounds = array<i64: 64, 1>}, {pipeline_mode = #tpu.pipeline_mode<synchronous>, transform_indices = @transform_3, window_bounds = array<i64: 64, 64>}, {pipeline_mode = #tpu.pipeline_mode<synchronous>, transform_indices = @transform_4, window_bounds = array<i64: 64, 1>}, {pipeline_mode = #tpu.pipeline_mode<synchronous>, transform_indices = @transform_5, window_bounds = array<i64: 5, 64>}, {pipeline_mode = #tpu.pipeline_mode<synchronous>, transform_indices = @transform_6, window_bounds = array<i64: 5, 1>}, {transform_indices = @transform_7, window_bounds = array<i64: 1, 5, 16>}]} {
    %c0 = arith.constant 0 : index
    %c0_0 = arith.constant 0 : index
    %0 = vector.load %arg3[%c0, %c0_0] : memref<64x32xbf16, #tpu.memory_space<vmem>>, vector<64x32xbf16>
    %c0_1 = arith.constant 0 : index
    %c0_2 = arith.constant 0 : index
    %1 = vector.load %arg5[%c0_1, %c0_2] : memref<64x64xbf16, #tpu.memory_space<vmem>>, vector<64x64xbf16>
    %c0_3 = arith.constant 0 : index
    %c0_4 = arith.constant 0 : index
    %2 = vector.load %arg7[%c0_3, %c0_4] : memref<5x64xbf16, #tpu.memory_space<vmem>>, vector<5x64xbf16>
    %c0_5 = arith.constant 0 : index
    %c0_6 = arith.constant 0 : index
    %3 = vector.load %arg4[%c0_5, %c0_6] : memref<64x1xf32, #tpu.memory_space<vmem>>, vector<64x1xf32>
    %c0_7 = arith.constant 0 : index
    %c0_8 = arith.constant 0 : index
    %4 = vector.load %arg6[%c0_7, %c0_8] : memref<64x1xf32, #tpu.memory_space<vmem>>, vector<64x1xf32>
    %c0_9 = arith.constant 0 : index
    %c0_10 = arith.constant 0 : index
    %5 = vector.load %arg8[%c0_9, %c0_10] : memref<5x1xf32, #tpu.memory_space<vmem>>, vector<5x1xf32>
    %c0_11 = arith.constant 0 : index
    %c0_12 = arith.constant 0 : index
    %c0_13 = arith.constant 0 : index
    %6 = vector.load %arg2[%c0_11, %c0_12, %c0_13] : memref<1x32x16xf32, #tpu.memory_space<vmem>>, vector<1x32x16xf32>
    %7 = vector.shape_cast %6 : vector<1x32x16xf32> to vector<32x16xf32>
    %8 = arith.truncf %7 : vector<32x16xf32> to vector<32x16xbf16>
    %cst = arith.constant dense<0.000000e+00> : vector<64x16xf32>
    %9 = tpu.matmul %0, %8, %cst {dimension_numbers = #tpu.dot_dimension_numbers<[1], [0], [0], [1], [0, 0, 1, 1], [], []>} : vector<64x32xbf16>, vector<32x16xbf16>, vector<64x16xf32> -> vector<64x16xf32>
    %10 = vector.broadcast %3 : vector<64x1xf32> to vector<64x16xf32>
    %11 = arith.addf %9, %10 : vector<64x16xf32>
    %cst_14 = arith.constant 0.000000e+00 : f32
    %12 = vector.broadcast %cst_14 : f32 to vector<64x16xf32>
    %13 = arith.maximumf %11, %12 : vector<64x16xf32>
    %14 = arith.truncf %13 : vector<64x16xf32> to vector<64x16xbf16>
    %cst_15 = arith.constant dense<0.000000e+00> : vector<64x16xf32>
    %15 = tpu.matmul %1, %14, %cst_15 {dimension_numbers = #tpu.dot_dimension_numbers<[1], [0], [0], [1], [0, 0, 1, 1], [], []>} : vector<64x64xbf16>, vector<64x16xbf16>, vector<64x16xf32> -> vector<64x16xf32>
    %16 = vector.broadcast %4 : vector<64x1xf32> to vector<64x16xf32>
    %17 = arith.addf %15, %16 : vector<64x16xf32>
    %cst_16 = arith.constant 0.000000e+00 : f32
    %18 = vector.broadcast %cst_16 : f32 to vector<64x16xf32>
    %19 = arith.maximumf %17, %18 : vector<64x16xf32>
    %20 = arith.truncf %19 : vector<64x16xf32> to vector<64x16xbf16>
    %cst_17 = arith.constant dense<0.000000e+00> : vector<5x16xf32>
    %21 = tpu.matmul %2, %20, %cst_17 {dimension_numbers = #tpu.dot_dimension_numbers<[1], [0], [0], [1], [0, 0, 1, 1], [], []>} : vector<5x64xbf16>, vector<64x16xbf16>, vector<5x16xf32> -> vector<5x16xf32>
    %22 = vector.broadcast %5 : vector<5x1xf32> to vector<5x16xf32>
    %23 = arith.addf %21, %22 : vector<5x16xf32>
    %c0_18 = arith.constant 0 : index
    %c0_19 = arith.constant 0 : index
    %c0_20 = arith.constant 0 : index
    %24 = vector.load %arg9[%c0_18, %c0_19, %c0_20] : memref<1x5x16xf32, #tpu.memory_space<vmem>>, vector<1x5x16xf32>
    %25 = vector.shape_cast %24 : vector<1x5x16xf32> to vector<5x16xf32>
    %26 = vector.shape_cast %23 : vector<5x16xf32> to vector<1x5x16xf32>
    tpu.vector_store %arg9[%c0_18, %c0_19, %c0_20], %26 {strides = array<i32>} : memref<1x5x16xf32, #tpu.memory_space<vmem>>, vector<1x5x16xf32>,
    return
  }
  func.func @transform_0(%arg0: i32, %arg1: i32) -> (i32, i32, i32) {
    %c0_i32 = arith.constant 0 : i32
    %c0_i32_0 = arith.constant 0 : i32
    return %arg0, %c0_i32, %arg1 : i32, i32, i32
  }
  func.func @transform_1(%arg0: i32, %arg1: i32) -> (i32, i32) {
    %c0_i32 = arith.constant 0 : i32
    %c0_i32_0 = arith.constant 0 : i32
    %c0_i32_1 = arith.constant 0 : i32
    return %c0_i32, %c0_i32_0 : i32, i32
  }
  func.func @transform_2(%arg0: i32, %arg1: i32) -> (i32, i32) {
    %c0_i32 = arith.constant 0 : i32
    %c0_i32_0 = arith.constant 0 : i32
    %c0_i32_1 = arith.constant 0 : i32
    return %c0_i32, %c0_i32_0 : i32, i32
  }
  func.func @transform_3(%arg0: i32, %arg1: i32) -> (i32, i32) {
    %c0_i32 = arith.constant 0 : i32
    %c0_i32_0 = arith.constant 0 : i32
    %c0_i32_1 = arith.constant 0 : i32
    return %c0_i32, %c0_i32_0 : i32, i32
  }
  func.func @transform_4(%arg0: i32, %arg1: i32) -> (i32, i32) {
    %c0_i32 = arith.constant 0 : i32
    %c0_i32_0 = arith.constant 0 : i32
    %c0_i32_1 = arith.constant 0 : i32
    return %c0_i32, %c0_i32_0 : i32, i32
  }
  func.func @transform_5(%arg0: i32, %arg1: i32) -> (i32, i32) {
    %c0_i32 = arith.constant 0 : i32
    %c0_i32_0 = arith.constant 0 : i32
    %c0_i32_1 = arith.constant 0 : i32
    return %c0_i32, %c0_i32_0 : i32, i32
  }
  func.func @transform_6(%arg0: i32, %arg1: i32) -> (i32, i32) {
    %c0_i32 = arith.constant 0 : i32
    %c0_i32_0 = arith.constant 0 : i32
    %c0_i32_1 = arith.constant 0 : i32
    return %c0_i32, %c0_i32_0 : i32, i32
  }
  func.func @transform_7(%arg0: i32, %arg1: i32) -> (i32, i32, i32) {
    %c0_i32 = arith.constant 0 : i32
    %c0_i32_0 = arith.constant 0 : i32
    return %arg0, %c0_i32, %arg1 : i32, i32, i32
  }
}

</mosaic_0001>

<bundles_post_ra>
// kernel: tpu_custom_call.1
= control target key start
LH: loop header
LB: loop body
LE: loop exit
PB: predicated region body
PF: predicated region fallthrough
CT: control target
= control target key end

     0   :  { %s967_s24 = smov 0   ;;  %s969_s25 = smov 0   ;;  %s1091_s0 = inlined_call_operand.vmem [shape: f32[2,32,16], index: 0, kind: input, shape index: {}]   ;;  %s1092_s1 = inlined_call_operand.vmem [shape: bf16[64,32], index: 1, kind: input, shape index: {}]   ;;  %s1093_s2 = inlined_call_operand.vmem [shape: f32[64,1], index: 2, kind: input, shape index: {}]   ;;  %s1094_s3 = inlined_call_operand.vmem [shape: bf16[64,64], index: 3, kind: input, shape index: {}]   ;;  %s1095_s4 = inlined_call_operand.vmem [shape: f32[64,1], index: 4, kind: input, shape index: {}]   ;;  %s1096_s5 = inlined_call_operand.vmem [shape: bf16[5,64], index: 5, kind: input, shape index: {}]   ;;  %s1097_s6 = inlined_call_operand.vmem [shape: f32[5,1], index: 6, kind: input, shape index: {}]   ;;  %s1098_s7 = inlined_call_operand.vmem [shape: f32[2,5,16], index: 7, kind: output, shape index: {}]  }
   0x1   :  { %s971_s26 = smov 0  }
   0x2 LB: > { %s29_s27 = sadd.s32 1, %s918_s25  ;;  %p780_p0 = scmp.ge.s32.totalorder %s922_s26, 1  ;;  %s922_s26 = sphi %s971_s26, %s17_s26   ;;  %s918_s25 = sphi %s969_s25, %s1100_s25   ;;  %s914_s24 = sphi %s967_s24, %s1099_s24  }
   0x3   : > { %p31_p1 = scmp.ge.s32.totalorder %s29_s27, 2  ;;  %p256_p2 = scmp.lt.s32.totalorder %s922_s26, 3 }
   0x5   : > { %s1102_s27 = smov (%p31_p1, %s29_s27), 0  ;;  %p257_p3 = pnand %p780_p0, %p256_p2 }
   0x6   : > { %p293_p4 = scmp.lt.s32.totalorder (!%p257_p3), %s914_s24, 1  ;;  %v892_v0 = vld [vmem:[%s1092_s1] sm:$0xff] (!%p257_p3)   ;;  %vm409_vm0 = vcmask (!%p257_p3), 261120   ;;  %v924_v1 = vmov (!%p257_p3), 0   ;;  %v328_v3 = vld [vmem:[%s1093_s2 + $0x10] sm:$0xff] (!%p257_p3)  ;;  %v327_v4 = vld [vmem:[%s1093_s2 + $0x8] sm:$0xff] (!%p257_p3) }
   0x7   : > { %260 = sbr.rel (%p257_p3) target bundleno = 716 (0x2cc), region = 48  ;;  %827 = vmatprep.mubr.msk.bf16.mxu0 (!%p257_p3), %vm409_vm0, %v892_v0  ;;  %890 = vset.pattern.permute.xlu0 (!%p257_p3), %v924_v1  ;;  %v326_v2 = vld [vmem:[%s1093_s2] sm:$0xff] (!%p257_p3)  ;;  %v329_v10 = vld [vmem:[%s1093_s2 + $0x18] sm:$0xff] (!%p257_p3)  ;;  %v331_v13 = vld [vmem:[%s1093_s2 + $0x28] sm:$0xff] (!%p257_p3)  ;;  %vm559_vm1 = vcmask (!%p257_p3), 523264   ;;  %vm926_vm2 = vmmov (!%p257_p3), 0  }
   0x8   : > { %891 = vset.pattern.permute.xlu1 (!%p257_p3), %v924_v1  ;;  %351 = vperm.xlu0 (!%p257_p3), %890, %v326_v2   ;;  %v330_v12 = vld [vmem:[%s1093_s2 + $0x20] sm:$0xff] (!%p257_p3)  ;;  %v893_v14 = vld [vmem:[%s1092_s1 + $0x8] sm:$0xff] (!%p257_p3)   ;;  %v894_v15 = vld [vmem:[%s1092_s1 + $0x10] sm:$0xff] (!%p257_p3)   ;;  %vm697_vm3 = vcmask (!%p257_p3), 126976  }
   0x9   : > { %361 = vperm.xlu1 (!%p257_p3), %891, %v328_v3   ;;  %v332_v16 = vld [vmem:[%s1093_s2 + $0x30] sm:$0xff] (!%p257_p3)  ;;  %v333_v17 = vld [vmem:[%s1093_s2 + $0x38] sm:$0xff] (!%p257_p3)  ;;  %v334_v18 = vld [vmem:[%s1095_s4] sm:$0xff] (!%p257_p3) }
   0xa   : > { %v335_v19 = vld [vmem:[%s1095_s4 + $0x8] sm:$0xff] (!%p257_p3)  ;;  %v895_v20 = vld [vmem:[%s1092_s1 + $0x18] sm:$0xff] (!%p257_p3)   ;;  %v336_v21 = vld [vmem:[%s1095_s4 + $0x10] sm:$0xff] (!%p257_p3) }
   0xb   : > { %v337_v22 = vld [vmem:[%s1095_s4 + $0x18] sm:$0xff] (!%p257_p3)  ;;  %v338_v23 = vld [vmem:[%s1095_s4 + $0x20] sm:$0xff] (!%p257_p3)  ;;  %v339_v24 = vld [vmem:[%s1095_s4 + $0x28] sm:$0xff] (!%p257_p3) }
   0xc   : > { %356 = vperm.xlu0 (!%p257_p3), %890, %v327_v4   ;;  %v340_v25 = vld [vmem:[%s1095_s4 + $0x30] sm:$0xff] (!%p257_p3)  ;;  %v341_v26 = vld [vmem:[%s1095_s4 + $0x38] sm:$0xff] (!%p257_p3)  ;;  %v342_v27 = vld [vmem:[%s1097_s6] sm:$0x1f] (!%p257_p3)  ;;  %v925_v4 = vmov (!%p257_p3), 0.0  }
   0xd   : > { %366 = vperm.xlu1 (!%p257_p3), %891, %v329_v10   ;;  %v896_v28 = vld [vmem:[%s1094_s3] sm:$0xff] (!%p257_p3)   ;;  %v897_v1 = vld [vmem:[%s1094_s3 + $0x8] sm:$0xff] (!%p257_p3)   ;;  %v898_v2 = vld [vmem:[%s1094_s3 + $0x10] sm:$0xff] (!%p257_p3)  }
   0xe   : > { %s1104_s24 = smov (!%p293_p4, %s914_s24), 1  ;;  %843 = vmatprep.mubr.msk.bf16.mxu1 %vm559_vm1, %v896_v28  ;;  %v899_v3 = vld [vmem:[%s1094_s3 + $0x18] sm:$0xff]  }
   0xf   : > { %s803_s30 = sshll.u32 %s1104_s24, 5  ;;  %s783_s23 = sshll.u32 %s1104_s24, 3 }
  0x10   : > { %s300_s14 = scalar_lea.vmem %s1091_s0, %s803_s30  ;;  %371 = vperm.xlu0 %890, %v330_v12   ;;  %s307_s30 = scalar_lea.vmem %s1098_s7, %s783_s23 }
  0x11   : > { %v343_v5 = vld [vmem:[%s300_s14] sm:$0xff]  ;;  %v344_v6 = vld [vmem:[%s300_s14 + $0x8] sm:$0xff]  ;;  %v345_v7 = vld [vmem:[%s300_s14 + $0x10] sm:$0xff]  ;;  %376 = vperm.xlu1 %891, %v331_v13  }
  0x12   : > { %v347_v8 = vpack.c.bf16 %v344_v6, %v343_v5  ;;  %v346_v9 = vld [vmem:[%s300_s14 + $0x18] sm:$0xff] }
  0x13   : > { %v348_v11 = vpack.c.bf16 %v346_v9, %v345_v7 }
  0x14   : > { %823 = vmatprep.subr.bf16.mxu0 %v347_v8  ;;  %381 = vperm.xlu0 %890, %v332_v16  }
  0x15   : > { %824 = vmatpush3.bf16.msra.mxu0 %v347_v8  ;;  %386 = vperm.xlu1 %891, %v333_v17  }
  0x16   : > { %825 = vmatprep.subr.bf16.mxu0 %v348_v11 }
  0x18   : > { %501 = vperm.xlu0 %890, %v334_v18  }
  0x19   : > { %826 = vmatpush3.bf16.msra.mxu0 %v348_v11  ;;  %506 = vperm.xlu1 %891, %v335_v19  }
  0x1a   : > { %851 = vmatprep.subr.bf16.mxu0 %v925_v4 }
  0x1c   : > { %828 = vmatmul.mubr.msk.bf16.vlgmr.msra.gmra.mrb[0].mxu0 %vm409_vm0, %v893_v14  ;;  %511 = vperm.xlu0 %890, %v336_v21  }
  0x1d   : > { %831 = vmatprep.mubr.msk.bf16.mxu0 %vm409_vm0, %v894_v15  ;;  %516 = vperm.xlu1 %891, %v337_v22  }
  0x20   : > { %521 = vperm.xlu0 %890, %v338_v23  }
  0x21   : > { %526 = vperm.xlu1 %891, %v339_v24  }
  0x24   : > { %832 = vmatmul.mubr.msk.bf16.gmra.mrb[4].mxu0 %vm409_vm0, %v895_v20  ;;  %531 = vperm.xlu0 %890, %v340_v25  }
  0x25   : > { %536 = vperm.xlu1 %891, %v341_v26   ;;  %859 = vmatprep.mubr.msk.bf16.mxu0 %vm926_vm2, %v925_v4 }
  0x28   : > { %651 = vperm.xlu0 %890, %v342_v27  }
  0x87   : > { %v352_v29 = vpop.permute.xlu0 %351 }
  0x88   : > { %v362_v30 = vpop.permute.xlu1 %361 }
  0x8b   : > { %v357_v31 = vpop.permute.xlu0 %356 }
  0x8c   : > { %v367_v32 = vpop.permute.xlu1 %366 }
  0x8f   : > { %v372_v36 = vpop.permute.xlu0 %371 }
  0x90   : > { %v377_v41 = vpop.permute.xlu1 %376 }
  0x93   : > { %v382_v48 = vpop.permute.xlu0 %381 }
  0x94   : > { %v387_v53 = vpop.permute.xlu1 %386 }
  0x97   : > { %v502_v5 = vpop.permute.xlu0 %501 }
  0x98   : > { %v507_v6 = vpop.permute.xlu1 %506 }
  0x9b   : > { %v512_v7 = vpop.permute.xlu0 %511 }
  0x9c   : > { %v517_v8 = vpop.permute.xlu1 %516 }
  0x9f   : > { %v522_v12 = vpop.permute.xlu0 %521 }
  0xa0   : > { %v527_v17 = vpop.permute.xlu1 %526 }
  0xa3   : > { %v532_v24 = vpop.permute.xlu0 %531 }
  0xef   : > { %v829_v33 = vpop.f32.mrb[0].mxu0 }
  0xf0   : > { %v465_v34 = vadd.f32 %v829_v33, %v362_v30  ;;  %v456_v35 = vpop.f32.mrb[1].mxu0 }
  0xf1   : > { %v457_v37 = vadd.f32 %v456_v35, %v352_v29  ;;  %v830_v38 = vpop.f32.mrb[2].mxu0  ;;  %v537_v29 = vpop.permute.xlu1 %536 }
  0xf2   : > { %v468_v39 = vadd.f32 %v830_v38, %v367_v32  ;;  %v459_v40 = vpop.f32.mrb[3].mxu0  ;;  %v489_v43 = vmax.f32 %v465_v34, 0.0 }
  0xf3   : > { %v460_v42 = vadd.f32 %v459_v40, %v357_v31  ;;  %v487_v45 = vmax.f32 %v457_v37, 0.0 }
  0xf4   : > { %v490_v44 = vmax.f32 %v468_v39, 0.0 }
  0xf5   : > { %v488_v46 = vmax.f32 %v460_v42, 0.0  ;;  %v652_v42 = vpop.permute.xlu0 %651 }
  0xf6   : > { %v496_v47 = vpack.c.bf16 %v490_v44, %v489_v43 }
  0xf7   : > { %v833_v49 = vpop.f32.mrb[4].mxu0  ;;  %v495_v50 = vpack.c.bf16 %v488_v46, %v487_v45 }
  0xf8   : > { %v481_v51 = vadd.f32 %v833_v49, %v382_v48  ;;  %v472_v52 = vpop.f32.mrb[5].mxu0 }
  0xf9   : > { %v473_v54 = vadd.f32 %v472_v52, %v372_v36  ;;  %v834_v55 = vpop.f32.mrb[6].mxu0  ;;  %835 = vmatprep.subr.bf16.mxu1 %v495_v50 }
  0xfa   : > { %v484_v56 = vadd.f32 %v834_v55, %v387_v53  ;;  %v475_v57 = vpop.f32.mrb[7].mxu0  ;;  %836 = vmatpush3.bf16.msra.mxu1 %v495_v50  ;;  %v493_v59 = vmax.f32 %v481_v51, 0.0 }
  0xfb   : > { %v476_v58 = vadd.f32 %v475_v57, %v377_v41  ;;  %837 = vmatprep.subr.bf16.mxu1 %v496_v47  ;;  %v491_v61 = vmax.f32 %v473_v54, 0.0  ;;  %v325_v41 = vld [vmem:[%s1096_s5] sm:$0x7] }
  0xfc   : > { %v494_v60 = vmax.f32 %v484_v56, 0.0 }
  0xfd   : > { %v492_v62 = vmax.f32 %v476_v58, 0.0 }
  0xfe   : > { %v498_v63 = vpack.c.bf16 %v494_v60, %v493_v59  ;;  %838 = vmatpush3.bf16.msra.mxu1 %v496_v47 }
  0xff   : > { %v497_v0 = vpack.c.bf16 %v492_v62, %v491_v61 }
 0x101   : > { %839 = vmatprep.subr.bf16.mxu1 %v497_v0 }
 0x102   : > { %840 = vmatpush3.bf16.msra.mxu1 %v497_v0 }
 0x103   : > { %841 = vmatprep.subr.bf16.mxu1 %v498_v63 }
 0x106   : > { %842 = vmatpush3.bf16.msra.mxu1 %v498_v63 }
 0x109   : > { %844 = vmatmul.mubr.msk.bf16.vlgmr.msra.gmra.mrb[0].mxu1 %vm559_vm1, %v897_v1 }
 0x10a   : > { %847 = vmatprep.mubr.msk.bf16.mxu1 %vm559_vm1, %v898_v2 }
 0x111   : > { %848 = vmatmul.mubr.msk.bf16.gmra.mrb[4].mxu1 %vm559_vm1, %v899_v3 }
 0x1dc   : > { %v845_v9 = vpop.f32.mrb[0].mxu1 }
 0x1dd   : > { %v615_v10 = vadd.f32 %v845_v9, %v512_v7  ;;  %v606_v11 = vpop.f32.mrb[1].mxu1 }
 0x1de   : > { %v607_v13 = vadd.f32 %v606_v11, %v502_v5  ;;  %v846_v14 = vpop.f32.mrb[2].mxu1 }
 0x1df   : > { %v618_v15 = vadd.f32 %v846_v14, %v517_v8  ;;  %v609_v16 = vpop.f32.mrb[3].mxu1  ;;  %v639_v19 = vmax.f32 %v615_v10, 0.0 }
 0x1e0   : > { %v610_v18 = vadd.f32 %v609_v16, %v507_v6  ;;  %v637_v21 = vmax.f32 %v607_v13, 0.0 }
 0x1e1   : > { %v640_v20 = vmax.f32 %v618_v15, 0.0 }
 0x1e2   : > { %v638_v22 = vmax.f32 %v610_v18, 0.0 }
 0x1e3   : > { %v646_v23 = vpack.c.bf16 %v640_v20, %v639_v19 }
 0x1e4   : > { %v645_v25 = vpack.c.bf16 %v638_v22, %v637_v21  ;;  %v849_v26 = vpop.f32.mrb[4].mxu1 }
 0x1e5   : > { %v631_v27 = vadd.f32 %v849_v26, %v532_v24  ;;  %v622_v28 = vpop.f32.mrb[5].mxu1 }
 0x1e6   : > { %v623_v30 = vadd.f32 %v622_v28, %v522_v12  ;;  %v850_v31 = vpop.f32.mrb[6].mxu1  ;;  %852 = vmatpush3.bf16.msra.mxu0 %v645_v25 }
 0x1e7   : > { %v634_v32 = vadd.f32 %v850_v31, %v537_v29  ;;  %v625_v33 = vpop.f32.mrb[7].mxu1  ;;  %853 = vmatprep.subr.bf16.mxu0 %v925_v4  ;;  %v643_v35 = vmax.f32 %v631_v27, 0.0 }
 0x1e8   : > { %v626_v34 = vadd.f32 %v625_v33, %v527_v17  ;;  %v641_v37 = vmax.f32 %v623_v30, 0.0 }
 0x1e9   : > { %v644_v36 = vmax.f32 %v634_v32, 0.0 }
 0x1ea   : > { %v642_v38 = vmax.f32 %v626_v34, 0.0  ;;  %854 = vmatpush3.bf16.msra.mxu0 %v646_v23 }
 0x1eb   : > { %v648_v39 = vpack.c.bf16 %v644_v36, %v643_v35  ;;  %855 = vmatprep.subr.bf16.mxu0 %v925_v4 }
 0x1ec   : > { %v647_v40 = vpack.c.bf16 %v642_v38, %v641_v37 }
 0x1ee   : > { %856 = vmatpush3.bf16.msra.mxu0 %v647_v40 }
 0x1ef   : > { %857 = vmatprep.subr.bf16.mxu0 %v925_v4 }
 0x1f2   : > { %858 = vmatpush3.bf16.msra.mxu0 %v648_v39 }
 0x1f5   : > { %860 = vmatmul.mubr.msk.bf16.vlgmr.msra.gmra.mrb[8].mxu0 %vm559_vm1, %v325_v41 }
 0x2c8   : > { %v691_v43 = vpop.f32.mrb[8].mxu0 }
 0x2c9   : > { %v692_v44 = vadd.f32 %v691_v43, %v652_v42  ;;  %v861_v45 = vpop.f32.mrb[9].mxu0 }
 0x2ca   : > { %v694_v46 = vpop.f32.mrb[10].mxu0 }
 0x2cb   : > { %698 = vst.msk [vmem:[%s307_s30] sm:$0x1f] %vm697_vm3, %v692_v44  ;;  %v862_v47 = vpop.f32.mrb[11].mxu0 }
 0x2cc PF: > { %s17_s26 = sadd.s32 1, %s922_s26   ;;  %s1099_s24 = smov %s918_s25 }
 0x2cd   : > { %p14_p5 = scmp.ge.s32.totalorder %s17_s26, 4   ;;  %s1100_s25 = smov %s1102_s27 }
 0x2cf   :  { %16 = sbr.rel (!%p14_p5) target bundleno = 2 (0x2), region = 78 }

// kernel: tpu_custom_call.1
= control target key start
LH: loop header
LB: loop body
LE: loop exit
PB: predicated region body
PF: predicated region fallthrough
CT: control target
= control target key end

     0   :  { %s967_s24 = smov 0   ;;  %s969_s25 = smov 0   ;;  %s1091_s0 = inlined_call_operand.vmem [shape: f32[2,32,16], index: 0, kind: input, shape index: {}]   ;;  %s1092_s1 = inlined_call_operand.vmem [shape: bf16[64,32], index: 1, kind: input, shape index: {}]   ;;  %s1093_s2 = inlined_call_operand.vmem [shape: f32[64,1], index: 2, kind: input, shape index: {}]   ;;  %s1094_s3 = inlined_call_operand.vmem [shape: bf16[64,64], index: 3, kind: input, shape index: {}]   ;;  %s1095_s4 = inlined_call_operand.vmem [shape: f32[64,1], index: 4, kind: input, shape index: {}]   ;;  %s1096_s5 = inlined_call_operand.vmem [shape: bf16[5,64], index: 5, kind: input, shape index: {}]   ;;  %s1097_s6 = inlined_call_operand.vmem [shape: f32[5,1], index: 6, kind: input, shape index: {}]   ;;  %s1098_s7 = inlined_call_operand.vmem [shape: f32[2,5,16], index: 7, kind: output, shape index: {}]  }
   0x1   :  { %s971_s26 = smov 0  }
   0x2 LB: > { %s29_s27 = sadd.s32 1, %s918_s25  ;;  %p780_p0 = scmp.ge.s32.totalorder %s922_s26, 1  ;;  %s922_s26 = sphi %s971_s26, %s17_s26   ;;  %s918_s25 = sphi %s969_s25, %s1100_s25   ;;  %s914_s24 = sphi %s967_s24, %s1099_s24  }
   0x3   : > { %p31_p1 = scmp.ge.s32.totalorder %s29_s27, 2  ;;  %p256_p2 = scmp.lt.s32.totalorder %s922_s26, 3 }
   0x5   : > { %s1102_s27 = smov (%p31_p1, %s29_s27), 0  ;;  %p257_p3 = pnand %p780_p0, %p256_p2 }
   0x6   : > { %p293_p4 = scmp.lt.s32.totalorder (!%p257_p3), %s914_s24, 1  ;;  %v892_v0 = vld [vmem:[%s1092_s1] sm:$0xff] (!%p257_p3)   ;;  %vm409_vm0 = vcmask (!%p257_p3), 261120   ;;  %v924_v1 = vmov (!%p257_p3), 0   ;;  %v328_v3 = vld [vmem:[%s1093_s2 + $0x10] sm:$0xff] (!%p257_p3)  ;;  %v327_v4 = vld [vmem:[%s1093_s2 + $0x8] sm:$0xff] (!%p257_p3) }
   0x7   : > { %260 = sbr.rel (%p257_p3) target bundleno = 716 (0x2cc), region = 48  ;;  %827 = vmatprep.mubr.msk.bf16.mxu0 (!%p257_p3), %vm409_vm0, %v892_v0  ;;  %890 = vset.pattern.permute.xlu0 (!%p257_p3), %v924_v1  ;;  %v326_v2 = vld [vmem:[%s1093_s2] sm:$0xff] (!%p257_p3)  ;;  %v329_v10 = vld [vmem:[%s1093_s2 + $0x18] sm:$0xff] (!%p257_p3)  ;;  %v331_v13 = vld [vmem:[%s1093_s2 + $0x28] sm:$0xff] (!%p257_p3)  ;;  %vm559_vm1 = vcmask (!%p257_p3), 523264   ;;  %vm926_vm2 = vmmov (!%p257_p3), 0  }
   0x8   : > { %891 = vset.pattern.permute.xlu1 (!%p257_p3), %v924_v1  ;;  %351 = vperm.xlu0 (!%p257_p3), %890, %v326_v2   ;;  %v330_v12 = vld [vmem:[%s1093_s2 + $0x20] sm:$0xff] (!%p257_p3)  ;;  %v893_v14 = vld [vmem:[%s1092_s1 + $0x8] sm:$0xff] (!%p257_p3)   ;;  %v894_v15 = vld [vmem:[%s1092_s1 + $0x10] sm:$0xff] (!%p257_p3)   ;;  %vm697_vm3 = vcmask (!%p257_p3), 126976  }
   0x9   : > { %361 = vperm.xlu1 (!%p257_p3), %891, %v328_v3   ;;  %v332_v16 = vld [vmem:[%s1093_s2 + $0x30] sm:$0xff] (!%p257_p3)  ;;  %v333_v17 = vld [vmem:[%s1093_s2 + $0x38] sm:$0xff] (!%p257_p3)  ;;  %v334_v18 = vld [vmem:[%s1095_s4] sm:$0xff] (!%p257_p3) }
   0xa   : > { %v335_v19 = vld [vmem:[%s1095_s4 + $0x8] sm:$0xff] (!%p257_p3)  ;;  %v895_v20 = vld [vmem:[%s1092_s1 + $0x18] sm:$0xff] (!%p257_p3)   ;;  %v336_v21 = vld [vmem:[%s1095_s4 + $0x10] sm:$0xff] (!%p257_p3) }
   0xb   : > { %v337_v22 = vld [vmem:[%s1095_s4 + $0x18] sm:$0xff] (!%p257_p3)  ;;  %v338_v23 = vld [vmem:[%s1095_s4 + $0x20] sm:$0xff] (!%p257_p3)  ;;  %v339_v24 = vld [vmem:[%s1095_s4 + $0x28] sm:$0xff] (!%p257_p3) }
   0xc   : > { %356 = vperm.xlu0 (!%p257_p3), %890, %v327_v4   ;;  %v340_v25 = vld [vmem:[%s1095_s4 + $0x30] sm:$0xff] (!%p257_p3)  ;;  %v341_v26 = vld [vmem:[%s1095_s4 + $0x38] sm:$0xff] (!%p257_p3)  ;;  %v342_v27 = vld [vmem:[%s1097_s6] sm:$0x1f] (!%p257_p3)  ;;  %v925_v4 = vmov (!%p257_p3), 0.0  }
   0xd   : > { %366 = vperm.xlu1 (!%p257_p3), %891, %v329_v10   ;;  %v896_v28 = vld [vmem:[%s1094_s3] sm:$0xff] (!%p257_p3)   ;;  %v897_v1 = vld [vmem:[%s1094_s3 + $0x8] sm:$0xff] (!%p257_p3)   ;;  %v898_v2 = vld [vmem:[%s1094_s3 + $0x10] sm:$0xff] (!%p257_p3)  }
   0xe   : > { %s1104_s24 = smov (!%p293_p4, %s914_s24), 1  ;;  %843 = vmatprep.mubr.msk.bf16.mxu1 %vm559_vm1, %v896_v28  ;;  %v899_v3 = vld [vmem:[%s1094_s3 + $0x18] sm:$0xff]  }
   0xf   : > { %s803_s30 = sshll.u32 %s1104_s24, 5  ;;  %s783_s23 = sshll.u32 %s1104_s24, 3 }
  0x10   : > { %s300_s14 = scalar_lea.vmem %s1091_s0, %s803_s30  ;;  %371 = vperm.xlu0 %890, %v330_v12   ;;  %s307_s30 = scalar_lea.vmem %s1098_s7, %s783_s23 }
  0x11   : > { %v343_v5 = vld [vmem:[%s300_s14] sm:$0xff]  ;;  %v344_v6 = vld [vmem:[%s300_s14 + $0x8] sm:$0xff]  ;;  %v345_v7 = vld [vmem:[%s300_s14 + $0x10] sm:$0xff]  ;;  %376 = vperm.xlu1 %891, %v331_v13  }
  0x12   : > { %v347_v8 = vpack.c.bf16 %v344_v6, %v343_v5  ;;  %v346_v9 = vld [vmem:[%s300_s14 + $0x18] sm:$0xff] }
  0x13   : > { %v348_v11 = vpack.c.bf16 %v346_v9, %v345_v7 }
  0x14   : > { %823 = vmatprep.subr.bf16.mxu0 %v347_v8  ;;  %381 = vperm.xlu0 %890, %v332_v16  }
  0x15   : > { %824 = vmatpush3.bf16.msra.mxu0 %v347_v8  ;;  %386 = vperm.xlu1 %891, %v333_v17  }
  0x16   : > { %825 = vmatprep.subr.bf16.mxu0 %v348_v11 }
  0x18   : > { %501 = vperm.xlu0 %890, %v334_v18  }
  0x19   : > { %826 = vmatpush3.bf16.msra.mxu0 %v348_v11  ;;  %506 = vperm.xlu1 %891, %v335_v19  }
  0x1a   : > { %851 = vmatprep.subr.bf16.mxu0 %v925_v4 }
  0x1c   : > { %828 = vmatmul.mubr.msk.bf16.vlgmr.msra.gmra.mrb[0].mxu0 %vm409_vm0, %v893_v14  ;;  %511 = vperm.xlu0 %890, %v336_v21  }
  0x1d   : > { %831 = vmatprep.mubr.msk.bf16.mxu0 %vm409_vm0, %v894_v15  ;;  %516 = vperm.xlu1 %891, %v337_v22  }
  0x20   : > { %521 = vperm.xlu0 %890, %v338_v23  }
  0x21   : > { %526 = vperm.xlu1 %891, %v339_v24  }
  0x24   : > { %832 = vmatmul.mubr.msk.bf16.gmra.mrb[4].mxu0 %vm409_vm0, %v895_v20  ;;  %531 = vperm.xlu0 %890, %v340_v25  }
  0x25   : > { %536 = vperm.xlu1 %891, %v341_v26   ;;  %859 = vmatprep.mubr.msk.bf16.mxu0 %vm926_vm2, %v925_v4 }
  0x28   : > { %651 = vperm.xlu0 %890, %v342_v27  }
  0x87   : > { %v352_v29 = vpop.permute.xlu0 %351 }
  0x88   : > { %v362_v30 = vpop.permute.xlu1 %361 }
  0x8b   : > { %v357_v31 = vpop.permute.xlu0 %356 }
  0x8c   : > { %v367_v32 = vpop.permute.xlu1 %366 }
  0x8f   : > { %v372_v36 = vpop.permute.xlu0 %371 }
  0x90   : > { %v377_v41 = vpop.permute.xlu1 %376 }
  0x93   : > { %v382_v48 = vpop.permute.xlu0 %381 }
  0x94   : > { %v387_v53 = vpop.permute.xlu1 %386 }
  0x97   : > { %v502_v5 = vpop.permute.xlu0 %501 }
  0x98   : > { %v507_v6 = vpop.permute.xlu1 %506 }
  0x9b   : > { %v512_v7 = vpop.permute.xlu0 %511 }
  0x9c   : > { %v517_v8 = vpop.permute.xlu1 %516 }
  0x9f   : > { %v522_v12 = vpop.permute.xlu0 %521 }
  0xa0   : > { %v527_v17 = vpop.permute.xlu1 %526 }
  0xa3   : > { %v532_v24 = vpop.permute.xlu0 %531 }
  0xef   : > { %v829_v33 = vpop.f32.mrb[0].mxu0 }
  0xf0   : > { %v465_v34 = vadd.f32 %v829_v33, %v362_v30  ;;  %v456_v35 = vpop.f32.mrb[1].mxu0 }
  0xf1   : > { %v457_v37 = vadd.f32 %v456_v35, %v352_v29  ;;  %v830_v38 = vpop.f32.mrb[2].mxu0  ;;  %v537_v29 = vpop.permute.xlu1 %536 }
  0xf2   : > { %v468_v39 = vadd.f32 %v830_v38, %v367_v32  ;;  %v459_v40 = vpop.f32.mrb[3].mxu0  ;;  %v489_v43 = vmax.f32 %v465_v34, 0.0 }
  0xf3   : > { %v460_v42 = vadd.f32 %v459_v40, %v357_v31  ;;  %v487_v45 = vmax.f32 %v457_v37, 0.0 }
  0xf4   : > { %v490_v44 = vmax.f32 %v468_v39, 0.0 }
  0xf5   : > { %v488_v46 = vmax.f32 %v460_v42, 0.0  ;;  %v652_v42 = vpop.permute.xlu0 %651 }
  0xf6   : > { %v496_v47 = vpack.c.bf16 %v490_v44, %v489_v43 }
  0xf7   : > { %v833_v49 = vpop.f32.mrb[4].mxu0  ;;  %v495_v50 = vpack.c.bf16 %v488_v46, %v487_v45 }
  0xf8   : > { %v481_v51 = vadd.f32 %v833_v49, %v382_v48  ;;  %v472_v52 = vpop.f32.mrb[5].mxu0 }
  0xf9   : > { %v473_v54 = vadd.f32 %v472_v52, %v372_v36  ;;  %v834_v55 = vpop.f32.mrb[6].mxu0  ;;  %835 = vmatprep.subr.bf16.mxu1 %v495_v50 }
  0xfa   : > { %v484_v56 = vadd.f32 %v834_v55, %v387_v53  ;;  %v475_v57 = vpop.f32.mrb[7].mxu0  ;;  %836 = vmatpush3.bf16.msra.mxu1 %v495_v50  ;;  %v493_v59 = vmax.f32 %v481_v51, 0.0 }
  0xfb   : > { %v476_v58 = vadd.f32 %v475_v57, %v377_v41  ;;  %837 = vmatprep.subr.bf16.mxu1 %v496_v47  ;;  %v491_v61 = vmax.f32 %v473_v54, 0.0  ;;  %v325_v41 = vld [vmem:[%s1096_s5] sm:$0x7] }
  0xfc   : > { %v494_v60 = vmax.f32 %v484_v56, 0.0 }
  0xfd   : > { %v492_v62 = vmax.f32 %v476_v58, 0.0 }
  0xfe   : > { %v498_v63 = vpack.c.bf16 %v494_v60, %v493_v59  ;;  %838 = vmatpush3.bf16.msra.mxu1 %v496_v47 }
  0xff   : > { %v497_v0 = vpack.c.bf16 %v492_v62, %v491_v61 }
 0x101   : > { %839 = vmatprep.subr.bf16.mxu1 %v497_v0 }
 0x102   : > { %840 = vmatpush3.bf16.msra.mxu1 %v497_v0 }
 0x103   : > { %841 = vmatprep.subr.bf16.mxu1 %v498_v63 }
 0x106   : > { %842 = vmatpush3.bf16.msra.mxu1 %v498_v63 }
 0x109   : > { %844 = vmatmul.mubr.msk.bf16.vlgmr.msra.gmra.mrb[0].mxu1 %vm559_vm1, %v897_v1 }
 0x10a   : > { %847 = vmatprep.mubr.msk.bf16.mxu1 %vm559_vm1, %v898_v2 }
 0x111   : > { %848 = vmatmul.mubr.msk.bf16.gmra.mrb[4].mxu1 %vm559_vm1, %v899_v3 }
 0x1dc   : > { %v845_v9 = vpop.f32.mrb[0].mxu1 }
 0x1dd   : > { %v615_v10 = vadd.f32 %v845_v9, %v512_v7  ;;  %v606_v11 = vpop.f32.mrb[1].mxu1 }
 0x1de   : > { %v607_v13 = vadd.f32 %v606_v11, %v502_v5  ;;  %v846_v14 = vpop.f32.mrb[2].mxu1 }
 0x1df   : > { %v618_v15 = vadd.f32 %v846_v14, %v517_v8  ;;  %v609_v16 = vpop.f32.mrb[3].mxu1  ;;  %v639_v19 = vmax.f32 %v615_v10, 0.0 }
 0x1e0   : > { %v610_v18 = vadd.f32 %v609_v16, %v507_v6  ;;  %v637_v21 = vmax.f32 %v607_v13, 0.0 }
 0x1e1   : > { %v640_v20 = vmax.f32 %v618_v15, 0.0 }
 0x1e2   : > { %v638_v22 = vmax.f32 %v610_v18, 0.0 }
 0x1e3   : > { %v646_v23 = vpack.c.bf16 %v640_v20, %v639_v19 }
 0x1e4   : > { %v645_v25 = vpack.c.bf16 %v638_v22, %v637_v21  ;;  %v849_v26 = vpop.f32.mrb[4].mxu1 }
 0x1e5   : > { %v631_v27 = vadd.f32 %v849_v26, %v532_v24  ;;  %v622_v28 = vpop.f32.mrb[5].mxu1 }
 0x1e6   : > { %v623_v30 = vadd.f32 %v622_v28, %v522_v12  ;;  %v850_v31 = vpop.f32.mrb[6].mxu1  ;;  %852 = vmatpush3.bf16.msra.mxu0 %v645_v25 }
 0x1e7   : > { %v634_v32 = vadd.f32 %v850_v31, %v537_v29  ;;  %v625_v33 = vpop.f32.mrb[7].mxu1  ;;  %853 = vmatprep.subr.bf16.mxu0 %v925_v4  ;;  %v643_v35 = vmax.f32 %v631_v27, 0.0 }
 0x1e8   : > { %v626_v34 = vadd.f32 %v625_v33, %v527_v17  ;;  %v641_v37 = vmax.f32 %v623_v30, 0.0 }
 0x1e9   : > { %v644_v36 = vmax.f32 %v634_v32, 0.0 }
 0x1ea   : > { %v642_v38 = vmax.f32 %v626_v34, 0.0  ;;  %854 = vmatpush3.bf16.msra.mxu0 %v646_v23 }
 0x1eb   : > { %v648_v39 = vpack.c.bf16 %v644_v36, %v643_v35  ;;  %855 = vmatprep.subr.bf16.mxu0 %v925_v4 }
 0x1ec   : > { %v647_v40 = vpack.c.bf16 %v642_v38, %v641_v37 }
 0x1ee   : > { %856 = vmatpush3.bf16.msra.mxu0 %v647_v40 }
 0x1ef   : > { %857 = vmatprep.subr.bf16.mxu0 %v925_v4 }
 0x1f2   : > { %858 = vmatpush3.bf16.msra.mxu0 %v648_v39 }
 0x1f5   : > { %860 = vmatmul.mubr.msk.bf16.vlgmr.msra.gmra.mrb[8].mxu0 %vm559_vm1, %v325_v41 }
 0x2c8   : > { %v691_v43 = vpop.f32.mrb[8].mxu0 }
 0x2c9   : > { %v692_v44 = vadd.f32 %v691_v43, %v652_v42  ;;  %v861_v45 = vpop.f32.mrb[9].mxu0 }
 0x2ca   : > { %v694_v46 = vpop.f32.mrb[10].mxu0 }
 0x2cb   : > { %698 = vst.msk [vmem:[%s307_s30] sm:$0x1f] %vm697_vm3, %v692_v44  ;;  %v862_v47 = vpop.f32.mrb[11].mxu0 }
 0x2cc PF: > { %s17_s26 = sadd.s32 1, %s922_s26   ;;  %s1099_s24 = smov %s918_s25 }
 0x2cd   : > { %p14_p5 = scmp.ge.s32.totalorder %s17_s26, 4   ;;  %s1100_s25 = smov %s1102_s27 }
 0x2cf   :  { %16 = sbr.rel (!%p14_p5) target bundleno = 2 (0x2), region = 78 }

</bundles_post_ra>
